<compile_context>
chip_gen: v7x
topology: tpu7x:2x2x1
jax: 0.10.0
libtpu: 0.0.40
codegen_flags: <defaults>
</compile_context>

<pallas_src>
import jax
import jax.numpy as jnp
from jax.experimental import pallas as pl
from jax.experimental.pallas import tpu as pltpu


def _round_up(x, m):
    return ((x + m - 1) // m) * m


def _sp2v_kernel(alpha_ref, ue_ref, ie_ref, bias_ref, pred_ref, logits_ref):
    # alpha_ref : (1,) SMEM scalar
    # ue_ref/ie_ref : (tb, E) VMEM tiles in natural gather layout (f32 or bf16)
    # bias_ref : (tb, 1) fused bias column (user_b + prod_b + global_bias), f32
    # pred_ref/logits_ref : (tb, 1) f32 outputs
    ue = ue_ref[...].astype(jnp.float32)                       # upcast (free vs HBM)
    ie = ie_ref[...].astype(jnp.float32)
    dot = jnp.sum(ue * ie, axis=1, keepdims=True)              # (tb, 1) lane reduce (XLU)
    logits = alpha_ref[0] * dot + bias_ref[...]                # (tb, 1)
    logits_ref[...] = logits
    pred_ref[...] = jax.nn.sigmoid(logits)                     # exp/recip -> EUP slot


def _choose_tile(B, E, emb_itemsize, target_step_bytes):
    """Pick a batch tile (multiple of 128) so each grid step moves ~target bytes
    while the double-buffered inputs stay within a conservative VMEM budget."""
    per_row_bytes = 2 * E * emb_itemsize                  # user row + item row
    tb = max(128, target_step_bytes // max(1, per_row_bytes))
    # VMEM guard: 2 inputs x 2 buffers x tb*E*itemsize <= ~12 MiB (safe on v5e/v7x).
    tb = min(tb, (12 << 20) // max(1, 4 * E * emb_itemsize))
    tb = max(128, (tb // 128) * 128)
    b_min = _round_up(B, 128)
    tb = min(tb, b_min)
    # Keep the grid >= 2 steps when there is enough work, so the "parallel"
    # axis can feed both TensorCores on v7x.
    if b_min >= 256 and tb >= b_min:
        tb = max(128, _round_up(b_min // 2, 128))
    return tb


def cast_embedding_tables(params, dtype):
    """Optionally pre-cast the embedding tables once (e.g. to bf16) so the
    gather reads fewer HBM bytes.  f32 tables (default) give exact parity."""
    p = dict(params)
    p["user_emb"] = params["user_emb"].astype(dtype)
    p["item_emb"] = params["item_emb"].astype(dtype)
    return p


def supervised_prod2vec_forward(users, items, params, *, target_step_bytes=2 << 20):
    """Forward pass. users/items: int32 (B,). Returns (prediction, logits), each (B, 1)."""
    user_emb_table = params["user_emb"]                        # (n_user, E), f32 or bf16
    item_emb_table = params["item_emb"]                        # (n_item, E)
    alpha = params["alpha"].astype(jnp.float32)                # (1,)
    global_bias = params["global_bias"].astype(jnp.float32)    # (1,)
    user_b = params["user_b"]                                  # (n_user,)
    prod_b = params["prod_b"]                                  # (n_item,)

    B = users.shape[0]
    E = user_emb_table.shape[1]
    emb_dtype = user_emb_table.dtype
    emb_itemsize = jnp.dtype(emb_dtype).itemsize

    tb = _choose_tile(B, E, emb_itemsize, target_step_bytes)
    Bp = _round_up(B, tb)

    # Pad the cheap (B,)-sized index vectors BEFORE the gather (index 0 is valid),
    # so the gathered slabs come out already tile-aligned — no slab-sized pad pass.
    users_2 = users + users
    if Bp != B:
        pad = Bp - B
        users_2 = jnp.pad(users_2, (0, pad))
        items_p = jnp.pad(items, (0, pad))
    else:
        items_p = items

    # Row gathers in the tables' stored dtype, natural (Bp, E) layout (no transpose).
    # TODO(synk): for large E (>= ~512 B/row) fuse the gather into the kernel via
    # scalar-prefetched indices + per-row DMA from pl.ANY tables; for small E the
    # tiny DMAs are descriptor-bound and the XLA gather is better.
    ue = jnp.take(user_emb_table, users_2, axis=0)             # (Bp, E)
    ie = jnp.take(item_emb_table, items_p, axis=0)             # (Bp, E)

    # Single fused bias column: user_b + prod_b + global_bias.
    bias = (user_b[users_2] + prod_b[items_p] + global_bias[0]).astype(jnp.float32)
    bias = bias.reshape(Bp, 1)

    grid = (Bp // tb,)
    smem_spec = pl.BlockSpec(memory_space=pltpu.MemorySpace.SMEM)
    emb_spec = pl.BlockSpec((tb, E), lambda i: (i, 0))
    col_spec = pl.BlockSpec((tb, 1), lambda i: (i, 0))

    cost = pl.CostEstimate(
        flops=2 * E * Bp + 4 * Bp,
        transcendentals=Bp,
        bytes_accessed=2 * Bp * E * emb_itemsize + 3 * Bp * 4 + 4,
    )

    # Explicit VMEM limit: double-buffered inputs + bias + outputs, with headroom.
    needed = 4 * tb * E * emb_itemsize + 6 * tb * 4 + (1 << 20)
    vmem_limit = int(max(16 << 20, min(48 << 20, 2 * needed)))

    out_shape = (
        jax.ShapeDtypeStruct((Bp, 1), jnp.float32),            # prediction
        jax.ShapeDtypeStruct((Bp, 1), jnp.float32),            # logits
    )

    pred_p, logits_p = pl.pallas_call(
        _sp2v_kernel,
        out_shape=out_shape,
        grid_spec=pltpu.PrefetchScalarGridSpec(
            num_scalar_prefetch=0,
            grid=grid,
            in_specs=[
                smem_spec,    # alpha
                emb_spec,     # user embeddings, (tb, E)
                emb_spec,     # item embeddings, (tb, E)
                col_spec,     # fused bias,      (tb, 1)
            ],
            out_specs=[col_spec, col_spec],
        ),
        compiler_params=pltpu.CompilerParams(
            dimension_semantics=("parallel",),
            vmem_limit_bytes=vmem_limit),
        cost_estimate=cost,
    )(alpha, ue, ie, bias)

    return pred_p[:B], logits_p[:B]


def _xavier_uniform(key, shape):
    fan_in, fan_out = shape[-1], shape[0]
    bound = (6.0 / (fan_in + fan_out)) ** 0.5
    return jax.random.uniform(key, shape, jnp.float32, -bound, bound)


def init_params(key, n_user, n_item, emb_size):
    k_u, k_i, k_a, k_g = jax.random.split(key, 4)
    return {
        "user_emb": _xavier_uniform(k_u, (n_user, emb_size)),
        "item_emb": _xavier_uniform(k_i, (n_item, emb_size)),
        # TODO(synk): torch xavier_uniform_ on 1-d / zero tensors is ill-defined in
        # the original __init__; use small deterministic values / zeros instead.
        "alpha": jax.random.uniform(k_a, (1,), jnp.float32, -0.1, 0.1),
        "global_bias": jax.random.uniform(k_g, (1,), jnp.float32, -0.1, 0.1),
        "user_b": jnp.zeros((n_user,), jnp.float32),
        "prod_b": jnp.zeros((n_item,), jnp.float32),
    }


def reference_forward(users, items, params):
    users_2 = users + users
    ue = params["user_emb"][users_2].astype(jnp.float32)
    ie = params["item_emb"][items].astype(jnp.float32)
    emb_logits = params["alpha"].astype(jnp.float32) * jnp.sum(ue * ie, axis=1, keepdims=True)
    logits = (params["user_b"][users_2] + params["prod_b"][items])[:, None] \
        + params["global_bias"].astype(jnp.float32)
    logits = emb_logits + logits
    return jax.nn.sigmoid(logits), logits


if __name__ == "__main__":
    n_user, n_item, emb_size, batch = 64, 32, 32, 300   # non-multiple of 128 -> exercises padding

    key = jax.random.PRNGKey(0)
    k_params, k_users, k_items = jax.random.split(key, 3)

    params = init_params(k_params, n_user, n_item, emb_size)
    # users kept < n_user // 2 so that users + users stays in range, as implied
    # by the PyTorch indexing of user_emb[users_2].
    users = jax.random.randint(k_users, (batch,), 0, n_user // 2, dtype=jnp.int32)
    items = jax.random.randint(k_items, (batch,), 0, n_item, dtype=jnp.int32)

    # Exact f32 path (default) — matches the original module (tight tolerance).
    pred32, log32 = supervised_prod2vec_forward(users, items, params)
    jax.block_until_ready((pred32, log32))
    ref_pred, ref_logits = reference_forward(users, items, params)
    assert pred32.shape == (batch, 1) and log32.shape == (batch, 1)
    assert jnp.allclose(log32, ref_logits, atol=1e-5, rtol=1e-5)
    assert jnp.allclose(pred32, ref_pred, atol=1e-5, rtol=1e-5)

    # Opt-in bf16 tables — halves table-read + slab HBM bytes on this memory-bound op.
    params_bf16 = cast_embedding_tables(params, jnp.bfloat16)
    pred16, log16 = supervised_prod2vec_forward(users, items, params_bf16)
    jax.block_until_ready((pred16, log16))
    ref_pred16, ref_log16 = reference_forward(users, items, params_bf16)
    assert jnp.allclose(log16, ref_log16, atol=1e-4, rtol=1e-4)
    assert jnp.allclose(pred16, ref_pred16, atol=1e-4, rtol=1e-4)
    assert jnp.allclose(log16, ref_logits, atol=3e-2, rtol=3e-2)
    assert jnp.allclose(pred16, ref_pred, atol=3e-2, rtol=3e-2)

    print("KERNEL_OK")
</pallas_src>

<mosaic_0001>
module attributes {stable_mosaic.version = 11 : i64} {
  func.func @_sp2v_kernel(%arg0: i32, %arg1: memref<1xf32, #tpu.memory_space<smem>>, %arg2: memref<256x32xf32, #tpu.memory_space<vmem>>, %arg3: memref<256x32xf32, #tpu.memory_space<vmem>>, %arg4: memref<256x1xf32, #tpu.memory_space<vmem>>, %arg5: memref<256x1xf32, #tpu.memory_space<vmem>>, %arg6: memref<256x1xf32, #tpu.memory_space<vmem>>) attributes {dimension_semantics = [#tpu.dimension_semantics<parallel>], iteration_bounds = array<i64: 2>, scalar_prefetch = 0 : i64, scratch_operands = 0 : i64, tpu.core_type = #tpu.core_type<tc>, window_params = [{transform_indices = @transform_0, window_bounds = array<i64: 1>}, {transform_indices = @transform_1, window_bounds = array<i64: 256, 32>}, {transform_indices = @transform_2, window_bounds = array<i64: 256, 32>}, {transform_indices = @transform_3, window_bounds = array<i64: 256, 1>}, {transform_indices = @transform_4, window_bounds = array<i64: 256, 1>}, {transform_indices = @transform_5, window_bounds = array<i64: 256, 1>}]} {
    %c0 = arith.constant 0 : index
    %c0_0 = arith.constant 0 : index
    %0 = vector.load %arg2[%c0, %c0_0] : memref<256x32xf32, #tpu.memory_space<vmem>>, vector<256x32xf32>
    %c0_1 = arith.constant 0 : index
    %c0_2 = arith.constant 0 : index
    %1 = vector.load %arg3[%c0_1, %c0_2] : memref<256x32xf32, #tpu.memory_space<vmem>>, vector<256x32xf32>
    %2 = arith.mulf %0, %1 : vector<256x32xf32>
    %cst = arith.constant dense<0.000000e+00> : vector<256xf32>
    %3 = vector.multi_reduction <add>, %2, %cst [1] : vector<256x32xf32> to vector<256xf32>
    %4 = vector.shape_cast %3 : vector<256xf32> to vector<256x1xf32>
    %c0_3 = arith.constant 0 : index
    %5 = memref.load %arg1[%c0_3] : memref<1xf32, #tpu.memory_space<smem>>
    %6 = vector.broadcast %5 : f32 to vector<256x1xf32>
    %7 = arith.mulf %6, %4 : vector<256x1xf32>
    %c0_4 = arith.constant 0 : index
    %c0_5 = arith.constant 0 : index
    %8 = vector.load %arg4[%c0_4, %c0_5] : memref<256x1xf32, #tpu.memory_space<vmem>>, vector<256x1xf32>
    %9 = arith.addf %7, %8 : vector<256x1xf32>
    %c0_6 = arith.constant 0 : index
    %c0_7 = arith.constant 0 : index
    %10 = vector.load %arg6[%c0_6, %c0_7] : memref<256x1xf32, #tpu.memory_space<vmem>>, vector<256x1xf32>
    tpu.vector_store %arg6[%c0_6, %c0_7], %9 {strides = array<i32>} : memref<256x1xf32, #tpu.memory_space<vmem>>, vector<256x1xf32>,
    %11 = arith.negf %9 : vector<256x1xf32>
    %12 = math.exp %11 : vector<256x1xf32>
    %cst_8 = arith.constant 1.000000e+00 : f32
    %13 = vector.broadcast %cst_8 : f32 to vector<256x1xf32>
    %14 = arith.addf %13, %12 : vector<256x1xf32>
    %15 = arith.divf %13, %14 : vector<256x1xf32>
    %c0_9 = arith.constant 0 : index
    %c0_10 = arith.constant 0 : index
    %16 = vector.load %arg5[%c0_9, %c0_10] : memref<256x1xf32, #tpu.memory_space<vmem>>, vector<256x1xf32>
    tpu.vector_store %arg5[%c0_9, %c0_10], %15 {strides = array<i32>} : memref<256x1xf32, #tpu.memory_space<vmem>>, vector<256x1xf32>,
    return
  }
  func.func @transform_0(%arg0: i32) -> i32 {
    %c0_i32 = arith.constant 0 : i32
    %c0_i32_0 = arith.constant 0 : i32
    return %c0_i32 : i32
  }
  func.func @transform_1(%arg0: i32) -> (i32, i32) {
    %c0_i32 = arith.constant 0 : i32
    %c0_i32_0 = arith.constant 0 : i32
    return %arg0, %c0_i32 : i32, i32
  }
  func.func @transform_2(%arg0: i32) -> (i32, i32) {
    %c0_i32 = arith.constant 0 : i32
    %c0_i32_0 = arith.constant 0 : i32
    return %arg0, %c0_i32 : i32, i32
  }
  func.func @transform_3(%arg0: i32) -> (i32, i32) {
    %c0_i32 = arith.constant 0 : i32
    %c0_i32_0 = arith.constant 0 : i32
    return %arg0, %c0_i32 : i32, i32
  }
  func.func @transform_4(%arg0: i32) -> (i32, i32) {
    %c0_i32 = arith.constant 0 : i32
    %c0_i32_0 = arith.constant 0 : i32
    return %arg0, %c0_i32 : i32, i32
  }
  func.func @transform_5(%arg0: i32) -> (i32, i32) {
    %c0_i32 = arith.constant 0 : i32
    %c0_i32_0 = arith.constant 0 : i32
    return %arg0, %c0_i32 : i32, i32
  }
}

</mosaic_0001>

<bundles_post_ra>
// kernel: tpu_custom_call.1
= control target key start
LH: loop header
LB: loop body
LE: loop exit
PB: predicated region body
PF: predicated region fallthrough
CT: control target
= control target key end

     0   :  { %s1175_s20 = smov 0   ;;  %s1508_s0 = inlined_call_operand.<no memory space> [shape: f32[1], index: 0, kind: input, shape index: {}]   ;;  %s1509_s1 = inlined_call_operand.vmem [shape: f32[512,32], index: 1, kind: input, shape index: {}]   ;;  %s1510_s2 = inlined_call_operand.vmem [shape: f32[512,32], index: 2, kind: input, shape index: {}]   ;;  %s1511_s3 = inlined_call_operand.vmem [shape: f32[512,1], index: 3, kind: input, shape index: {}]   ;;  %s1512_s4 = inlined_call_operand.vmem [shape: f32[512,1], index: 4, kind: output, shape index: {0}]   ;;  %s1513_s5 = inlined_call_operand.vmem [shape: f32[512,1], index: 5, kind: output, shape index: {1}]  }
   0x1   :  { %11 = sst [smem:[#allocation2]] %s1508_s0 }
   0x2 LB: > { %s949_s21 = sadd.s32 4294967295, %s1140_s20   ;;  %p953_p0 = scmp.ge.s32.totalorder %s1140_s20, 1  ;;  %s1140_s20 = sphi %s1175_s20, %s17_s20  }
   0x3   : > { %p214_p1 = scmp.lt.s32.totalorder %s1140_s20, 3 }
   0x5   : > { %p215_p2 = pnand %p953_p0, %p214_p1 }
   0x6   : > { %s954_s22 = sshll.u32 (!%p215_p2), %s949_s21, 5  ;;  %vm383_vm0 = vcmask (!%p215_p2), 261120   ;;  %s480_s29 = sld [smem:[#allocation2]] (!%p215_p2)  ;;  %vm578_vm1 = vcmask (!%p215_p2), 7168  }
   0x7   : > { %218 = sbr.rel (%p215_p2) target bundleno = 259 (0x103), region = 36  ;;  %p258_p3 = scmp.lt.s32.totalorder (!%p215_p2), %s954_s22, 63 }
   0xe   : > { %s1515_s22 = smov (!%p258_p3, %s954_s22), 63 }
   0xf   : > { %s1183_s23 = sshll.u32 %s1515_s22, 3 }
  0x10   : > { %s1189_s25 = scalar_lea.vmem %s1509_s1, %s1183_s23  ;;  %s1195_s28 = scalar_lea.vmem %s1510_s2, %s1183_s23 }
  0x11   : > { %v289_v0 = vld [vmem:[%s1189_s25 + $0x10] sm:$0xff]  ;;  %v287_v2 = vld [vmem:[%s1189_s25] sm:$0xff]  ;;  %v290_v5 = vld [vmem:[%s1189_s25 + $0x18] sm:$0xff]  ;;  %s1297_s7 = scalar_lea.vmem %s1511_s3, %s1183_s23  ;;  %s1308_s10 = scalar_lea.vmem %s1513_s5, %s1183_s23 }
  0x12   : > { %v321_v1 = vld [vmem:[%s1195_s28 + $0x10] sm:$0xff]  ;;  %v319_v4 = vld [vmem:[%s1195_s28] sm:$0xff]  ;;  %v322_v6 = vld [vmem:[%s1195_s28 + $0x18] sm:$0xff]  ;;  %s1363_s13 = scalar_lea.vmem %s1512_s4, %s1183_s23 }
  0x13   : > { %v353_v3 = vmul.f32 %v321_v1, %v289_v0  ;;  %v351_v7 = vmul.f32 %v319_v4, %v287_v2  ;;  %v354_v8 = vmul.f32 %v322_v6, %v290_v5  ;;  %v288_v9 = vld [vmem:[%s1189_s25 + $0x8] sm:$0xff]  ;;  %v291_v15 = vld [vmem:[%s1189_s25 + $0x20] sm:$0xff]  ;;  %v294_v22 = vld [vmem:[%s1189_s25 + $0x38] sm:$0xff] }
  0x14   : > { %v320_v10 = vld [vmem:[%s1195_s28 + $0x8] sm:$0xff]  ;;  %v323_v16 = vld [vmem:[%s1195_s28 + $0x20] sm:$0xff]  ;;  %v326_v23 = vld [vmem:[%s1195_s28 + $0x38] sm:$0xff] }
  0x15   : > { %v292_v11 = vld [vmem:[%s1189_s25 + $0x28] sm:$0xff]  ;;  %v390_v12 = vsel %vm383_vm0, %v353_v3, 0.0  ;;  %v352_v13 = vmul.f32 %v320_v10, %v288_v9  ;;  %v384_v17 = vsel %vm383_vm0, %v351_v7, 0.0  ;;  %v393_v18 = vsel %vm383_vm0, %v354_v8, 0.0  ;;  %v293_v24 = vld [vmem:[%s1189_s25 + $0x30] sm:$0xff]  ;;  %v295_v32 = vld [vmem:[%s1189_s25 + $0x40] sm:$0xff] }
  0x16   : > { %v324_v14 = vld [vmem:[%s1195_s28 + $0x28] sm:$0xff]  ;;  %391 = vadd.xlane.f32.xlu1 %v390_v12  ;;  %385 = vadd.xlane.f32.xlu0 %v384_v17  ;;  %v355_v21 = vmul.f32 %v323_v16, %v291_v15  ;;  %v325_v25 = vld [vmem:[%s1195_s28 + $0x30] sm:$0xff]  ;;  %v358_v27 = vmul.f32 %v326_v23, %v294_v22  ;;  %v327_v33 = vld [vmem:[%s1195_s28 + $0x40] sm:$0xff] }
  0x17   : > { %v356_v19 = vmul.f32 %v324_v14, %v292_v11  ;;  %v387_v20 = vsel %vm383_vm0, %v352_v13, 0.0  ;;  %v357_v29 = vmul.f32 %v325_v25, %v293_v24  ;;  %v296_v30 = vld [vmem:[%s1189_s25 + $0x48] sm:$0xff]  ;;  %v359_v37 = vmul.f32 %v327_v33, %v295_v32  ;;  %v298_v38 = vld [vmem:[%s1189_s25 + $0x58] sm:$0xff]  ;;  %v297_v40 = vld [vmem:[%s1189_s25 + $0x50] sm:$0xff] }
  0x18   : > { %v396_v28 = vsel %vm383_vm0, %v355_v21, 0.0  ;;  %v328_v31 = vld [vmem:[%s1195_s28 + $0x48] sm:$0xff]  ;;  %v405_v34 = vsel %vm383_vm0, %v358_v27, 0.0  ;;  %v330_v39 = vld [vmem:[%s1195_s28 + $0x58] sm:$0xff]  ;;  %v329_v41 = vld [vmem:[%s1195_s28 + $0x50] sm:$0xff] }
  0x19   : > { %v399_v26 = vsel %vm383_vm0, %v356_v19, 0.0  ;;  %v360_v35 = vmul.f32 %v328_v31, %v296_v30  ;;  %v402_v36 = vsel %vm383_vm0, %v357_v29, 0.0  ;;  %v362_v43 = vmul.f32 %v330_v39, %v298_v38  ;;  %v300_v46 = vld [vmem:[%s1189_s25 + $0x68] sm:$0xff]  ;;  %v299_v48 = vld [vmem:[%s1189_s25 + $0x60] sm:$0xff]  ;;  %v302_v54 = vld [vmem:[%s1189_s25 + $0x78] sm:$0xff] }
  0x1a   : > { %394 = vadd.xlane.f32.xlu1 %v393_v18  ;;  %388 = vadd.xlane.f32.xlu0 %v387_v20  ;;  %v408_v44 = vsel %vm383_vm0, %v359_v37, 0.0  ;;  %v361_v45 = vmul.f32 %v329_v41, %v297_v40  ;;  %v332_v47 = vld [vmem:[%s1195_s28 + $0x68] sm:$0xff]  ;;  %v331_v49 = vld [vmem:[%s1195_s28 + $0x60] sm:$0xff]  ;;  %v334_v55 = vld [vmem:[%s1195_s28 + $0x78] sm:$0xff] }
  0x1b   : > { %v411_v42 = vsel %vm383_vm0, %v360_v35, 0.0  ;;  %v417_v50 = vsel %vm383_vm0, %v362_v43, 0.0  ;;  %v364_v51 = vmul.f32 %v332_v47, %v300_v46  ;;  %v363_v53 = vmul.f32 %v331_v49, %v299_v48  ;;  %v301_v56 = vld [vmem:[%s1189_s25 + $0x70] sm:$0xff]  ;;  %v304_v62 = vld [vmem:[%s1189_s25 + $0x88] sm:$0xff]  ;;  %v303_v0 = vld [vmem:[%s1189_s25 + $0x80] sm:$0xff] }
  0x1c   : > { %v414_v52 = vsel %vm383_vm0, %v361_v45, 0.0  ;;  %v333_v57 = vld [vmem:[%s1195_s28 + $0x70] sm:$0xff]  ;;  %v366_v59 = vmul.f32 %v334_v55, %v302_v54  ;;  %v336_v63 = vld [vmem:[%s1195_s28 + $0x88] sm:$0xff]  ;;  %v335_v1 = vld [vmem:[%s1195_s28 + $0x80] sm:$0xff] }
  0x1d   : > { %v423_v58 = vsel %vm383_vm0, %v364_v51, 0.0  ;;  %v420_v60 = vsel %vm383_vm0, %v363_v53, 0.0  ;;  %v365_v61 = vmul.f32 %v333_v57, %v301_v56  ;;  %v368_v3 = vmul.f32 %v336_v63, %v304_v62  ;;  %v306_v6 = vld [vmem:[%s1189_s25 + $0x98] sm:$0xff]  ;;  %v305_v8 = vld [vmem:[%s1189_s25 + $0x90] sm:$0xff]  ;;  %v308_v14 = vld [vmem:[%s1189_s25 + $0xa8] sm:$0xff] }
  0x1e   : > { %400 = vadd.xlane.f32.xlu1 %v399_v26  ;;  %397 = vadd.xlane.f32.xlu0 %v396_v28  ;;  %v429_v2 = vsel %vm383_vm0, %v366_v59, 0.0  ;;  %v367_v5 = vmul.f32 %v335_v1, %v303_v0  ;;  %v338_v7 = vld [vmem:[%s1195_s28 + $0x98] sm:$0xff]  ;;  %v337_v9 = vld [vmem:[%s1195_s28 + $0x90] sm:$0xff]  ;;  %v340_v15 = vld [vmem:[%s1195_s28 + $0xa8] sm:$0xff]  ;;  %v1299_v0 = vstv %s480_s29 }
  0x1f   : > { %v426_v4 = vsel %vm383_vm0, %v365_v61, 0.0  ;;  %v435_v10 = vsel %vm383_vm0, %v368_v3, 0.0  ;;  %v370_v11 = vmul.f32 %v338_v7, %v306_v6  ;;  %v369_v13 = vmul.f32 %v337_v9, %v305_v8  ;;  %v307_v16 = vld [vmem:[%s1189_s25 + $0xa0] sm:$0xff]  ;;  %v310_v22 = vld [vmem:[%s1189_s25 + $0xb8] sm:$0xff]  ;;  %v309_v24 = vld [vmem:[%s1189_s25 + $0xb0] sm:$0xff] }
  0x20   : > { %v432_v12 = vsel %vm383_vm0, %v367_v5, 0.0  ;;  %v339_v17 = vld [vmem:[%s1195_s28 + $0xa0] sm:$0xff]  ;;  %v372_v19 = vmul.f32 %v340_v15, %v308_v14  ;;  %v342_v23 = vld [vmem:[%s1195_s28 + $0xb8] sm:$0xff]  ;;  %v341_v25 = vld [vmem:[%s1195_s28 + $0xb0] sm:$0xff] }
  0x21   : > { %v441_v18 = vsel %vm383_vm0, %v370_v11, 0.0  ;;  %v438_v20 = vsel %vm383_vm0, %v369_v13, 0.0  ;;  %v371_v21 = vmul.f32 %v339_v17, %v307_v16  ;;  %v374_v27 = vmul.f32 %v342_v23, %v310_v22  ;;  %v312_v30 = vld [vmem:[%s1189_s25 + $0xc8] sm:$0xff]  ;;  %v311_v32 = vld [vmem:[%s1189_s25 + $0xc0] sm:$0xff]  ;;  %v314_v38 = vld [vmem:[%s1189_s25 + $0xd8] sm:$0xff] }
  0x22   : > { %406 = vadd.xlane.f32.xlu1 %v405_v34  ;;  %403 = vadd.xlane.f32.xlu0 %v402_v36  ;;  %v447_v26 = vsel %vm383_vm0, %v372_v19, 0.0  ;;  %v373_v29 = vmul.f32 %v341_v25, %v309_v24  ;;  %v344_v31 = vld [vmem:[%s1195_s28 + $0xc8] sm:$0xff]  ;;  %v343_v33 = vld [vmem:[%s1195_s28 + $0xc0] sm:$0xff]  ;;  %v346_v39 = vld [vmem:[%s1195_s28 + $0xd8] sm:$0xff] }
  0x23   : > { %v444_v28 = vsel %vm383_vm0, %v371_v21, 0.0  ;;  %v453_v34 = vsel %vm383_vm0, %v374_v27, 0.0  ;;  %v376_v35 = vmul.f32 %v344_v31, %v312_v30  ;;  %v375_v37 = vmul.f32 %v343_v33, %v311_v32  ;;  %v313_v40 = vld [vmem:[%s1189_s25 + $0xd0] sm:$0xff]  ;;  %v316_v46 = vld [vmem:[%s1189_s25 + $0xe8] sm:$0xff]  ;;  %v315_v48 = vld [vmem:[%s1189_s25 + $0xe0] sm:$0xff] }
  0x24   : > { %v450_v36 = vsel %vm383_vm0, %v373_v29, 0.0  ;;  %v345_v41 = vld [vmem:[%s1195_s28 + $0xd0] sm:$0xff]  ;;  %v378_v43 = vmul.f32 %v346_v39, %v314_v38  ;;  %v348_v47 = vld [vmem:[%s1195_s28 + $0xe8] sm:$0xff]  ;;  %v347_v49 = vld [vmem:[%s1195_s28 + $0xe0] sm:$0xff] }
  0x25   : > { %v377_v45 = vmul.f32 %v345_v41, %v313_v40  ;;  %v380_v51 = vmul.f32 %v348_v47, %v316_v46  ;;  %v379_v53 = vmul.f32 %v347_v49, %v315_v48  ;;  %v318_v54 = vld [vmem:[%s1189_s25 + $0xf8] sm:$0xff]  ;;  %v317_v56 = vld [vmem:[%s1189_s25 + $0xf0] sm:$0xff]  ;;  %v515_v13 = vld [vmem:[%s1297_s7 + $0x8] sm:$0xff] }
  0x26   : > { %412 = vadd.xlane.f32.xlu1 %v411_v42  ;;  %409 = vadd.xlane.f32.xlu0 %v408_v44  ;;  %v459_v42 = vsel %vm383_vm0, %v376_v35, 0.0  ;;  %v456_v44 = vsel %vm383_vm0, %v375_v37, 0.0  ;;  %v350_v55 = vld [vmem:[%s1195_s28 + $0xf8] sm:$0xff]  ;;  %v349_v57 = vld [vmem:[%s1195_s28 + $0xf0] sm:$0xff]  ;;  %v519_v19 = vld [vmem:[%s1297_s7 + $0x28] sm:$0xff] }
  0x27   : > { %v382_v59 = vmul.f32 %v350_v55, %v318_v54  ;;  %v381_v61 = vmul.f32 %v349_v57, %v317_v56  ;;  %v516_v1 = vld [vmem:[%s1297_s7 + $0x10] sm:$0xff]  ;;  %v517_v9 = vld [vmem:[%s1297_s7 + $0x18] sm:$0xff]  ;;  %v518_v23 = vld [vmem:[%s1297_s7 + $0x20] sm:$0xff] }
  0x28   : > { %v521_v29 = vld [vmem:[%s1297_s7 + $0x38] sm:$0xff]  ;;  %v520_v33 = vld [vmem:[%s1297_s7 + $0x30] sm:$0xff]  ;;  %v523_v39 = vld [vmem:[%s1297_s7 + $0x48] sm:$0xff] }
  0x29   : > { %v477_v62 = vsel %vm383_vm0, %v382_v59, 0.0  ;;  %v474_v63 = vsel %vm383_vm0, %v381_v61, 0.0 }
  0x2a   : > { %418 = vadd.xlane.f32.xlu1 %v417_v50  ;;  %415 = vadd.xlane.f32.xlu0 %v414_v52  ;;  %v465_v50 = vsel %vm383_vm0, %v378_v43, 0.0  ;;  %v462_v52 = vsel %vm383_vm0, %v377_v45, 0.0 }
  0x2e   : > { %424 = vadd.xlane.f32.xlu1 %v423_v58  ;;  %421 = vadd.xlane.f32.xlu0 %v420_v60  ;;  %v471_v58 = vsel %vm383_vm0, %v380_v51, 0.0  ;;  %v468_v60 = vsel %vm383_vm0, %v379_v53, 0.0  ;;  %v525_v53 = vld [vmem:[%s1297_s7 + $0x58] sm:$0xff] }
  0x32   : > { %430 = vadd.xlane.f32.xlu1 %v429_v2  ;;  %427 = vadd.xlane.f32.xlu0 %v426_v4  ;;  %v514_v4 = vld [vmem:[%s1297_s7] sm:$0xff] }
  0x36   : > { %436 = vadd.xlane.f32.xlu1 %v435_v10  ;;  %433 = vadd.xlane.f32.xlu0 %v432_v12 }
  0x3a   : > { %442 = vadd.xlane.f32.xlu1 %v441_v18  ;;  %439 = vadd.xlane.f32.xlu0 %v438_v20 }
  0x3e   : > { %448 = vadd.xlane.f32.xlu1 %v447_v26  ;;  %445 = vadd.xlane.f32.xlu0 %v444_v28 }
  0x42   : > { %454 = vadd.xlane.f32.xlu1 %v453_v34  ;;  %451 = vadd.xlane.f32.xlu0 %v450_v36 }
  0x46   : > { %460 = vadd.xlane.f32.xlu1 %v459_v42  ;;  %457 = vadd.xlane.f32.xlu0 %v456_v44  ;;  %v522_v44 = vld [vmem:[%s1297_s7 + $0x40] sm:$0xff] }
  0x4a   : > { %466 = vadd.xlane.f32.xlu1 %v465_v50  ;;  %463 = vadd.xlane.f32.xlu0 %v462_v52 }
  0x4e   : > { %472 = vadd.xlane.f32.xlu1 %v471_v58  ;;  %469 = vadd.xlane.f32.xlu0 %v468_v60  ;;  %v524_v58 = vld [vmem:[%s1297_s7 + $0x50] sm:$0xff] }
  0x52   : > { %478 = vadd.xlane.f32.xlu1 %v477_v62  ;;  %475 = vadd.xlane.f32.xlu0 %v474_v63 }
  0xa3   : > { %v392_v2 = vpop.xlane.xlu1 %391  ;;  %v386_v5 = vpop.xlane.xlu0 %385 }
  0xa4   : > { %v484_v3 = vmul.f32 %v1299_v0, %v392_v2  ;;  %v482_v6 = vmul.f32 %v1299_v0, %v386_v5 }
  0xa6   : > { %v548_v7 = vadd.f32 %v516_v1, %v484_v3  ;;  %v546_v8 = vadd.f32 %v514_v4, %v482_v6  ;;  %v527_v4 = vld [vmem:[%s1297_s7 + $0x68] sm:$0xff] }
  0xa7   : > { %v395_v10 = vpop.xlane.xlu1 %394  ;;  %v389_v14 = vpop.xlane.xlu0 %388 }
  0xa8   : > { %581 = vst.msk [vmem:[%s1308_s10 + $0x10] sm:$0xff] %vm578_vm1, %v548_v7  ;;  %v966_v11 = vmul.f32 -1.442695, %v548_v7  ;;  %v485_v12 = vmul.f32 %v1299_v0, %v395_v10  ;;  %579 = vst.msk [vmem:[%s1308_s10] sm:$0xff] %vm578_vm1, %v546_v8  ;;  %v964_v15 = vmul.f32 -1.442695, %v546_v8  ;;  %v483_v16 = vmul.f32 %v1299_v0, %v389_v14 }
  0xaa   : > { %1006 = vpow2.f32 %v966_v11  ;;  %v549_v17 = vadd.f32 %v517_v9, %v485_v12  ;;  %v547_v18 = vadd.f32 %v515_v13, %v483_v16  ;;  %v526_v9 = vld [vmem:[%s1297_s7 + $0x60] sm:$0xff] }
  0xab   : > { %1008 = vpow2.f32 %v964_v15  ;;  %v401_v20 = vpop.xlane.xlu1 %400  ;;  %v398_v24 = vpop.xlane.xlu0 %397 }
  0xac   : > { %582 = vst.msk [vmem:[%s1308_s10 + $0x18] sm:$0xff] %vm578_vm1, %v549_v17  ;;  %v967_v21 = vmul.f32 -1.442695, %v549_v17  ;;  %v487_v22 = vmul.f32 %v1299_v0, %v401_v20  ;;  %580 = vst.msk [vmem:[%s1308_s10 + $0x8] sm:$0xff] %vm578_vm1, %v547_v18  ;;  %v965_v25 = vmul.f32 -1.442695, %v547_v18  ;;  %v486_v26 = vmul.f32 %v1299_v0, %v398_v24 }
  0xad   : > { %v529_v18 = vld [vmem:[%s1297_s7 + $0x78] sm:$0xff] }
  0xae   : > { %1010 = vpow2.f32 %v967_v21  ;;  %v551_v27 = vadd.f32 %v519_v19, %v487_v22  ;;  %v550_v28 = vadd.f32 %v518_v23, %v486_v26  ;;  %v528_v23 = vld [vmem:[%s1297_s7 + $0x70] sm:$0xff] }
  0xaf   : > { %1012 = vpow2.f32 %v965_v25  ;;  %v407_v30 = vpop.xlane.xlu1 %406  ;;  %v404_v34 = vpop.xlane.xlu0 %403 }
  0xb0   : > { %584 = vst.msk [vmem:[%s1308_s10 + $0x28] sm:$0xff] %vm578_vm1, %v551_v27  ;;  %v969_v31 = vmul.f32 -1.442695, %v551_v27  ;;  %v489_v32 = vmul.f32 %v1299_v0, %v407_v30  ;;  %583 = vst.msk [vmem:[%s1308_s10 + $0x20] sm:$0xff] %vm578_vm1, %v550_v28  ;;  %v968_v35 = vmul.f32 -1.442695, %v550_v28  ;;  %v488_v36 = vmul.f32 %v1299_v0, %v404_v34 }
  0xb2   : > { %1014 = vpow2.f32 %v969_v31  ;;  %v553_v37 = vadd.f32 %v521_v29, %v489_v32  ;;  %v552_v38 = vadd.f32 %v520_v33, %v488_v36  ;;  %v531_v33 = vld [vmem:[%s1297_s7 + $0x88] sm:$0xff] }
  0xb3   : > { %1016 = vpow2.f32 %v968_v35  ;;  %v413_v40 = vpop.xlane.xlu1 %412  ;;  %v410_v45 = vpop.xlane.xlu0 %409 }
  0xb4   : > { %v1007_v41 = vpop.eup %1006  ;;  %586 = vst.msk [vmem:[%s1308_s10 + $0x38] sm:$0xff] %vm578_vm1, %v553_v37  ;;  %v971_v42 = vmul.f32 -1.442695, %v553_v37  ;;  %v491_v43 = vmul.f32 %v1299_v0, %v413_v40  ;;  %585 = vst.msk [vmem:[%s1308_s10 + $0x30] sm:$0xff] %vm578_vm1, %v552_v38  ;;  %v970_v48 = vmul.f32 -1.442695, %v552_v38  ;;  %v490_v49 = vmul.f32 %v1299_v0, %v410_v45 }
  0xb5   : > { %v1009_v46 = vpop.eup %1008  ;;  %v709_v47 = vadd.f32 1.0, %v1007_v41 }
  0xb6   : > { %v707_v50 = vadd.f32 1.0, %v1009_v46  ;;  %1018 = vpow2.f32 %v971_v42  ;;  %v555_v51 = vadd.f32 %v523_v39, %v491_v43  ;;  %v554_v52 = vadd.f32 %v522_v44, %v490_v49  ;;  %v530_v39 = vld [vmem:[%s1297_s7 + $0x80] sm:$0xff]  ;;  %v533_v49 = vld [vmem:[%s1297_s7 + $0x98] sm:$0xff] }
  0xb7   : > { %1020 = vrcp.f32 %v709_v47  ;;  %v419_v54 = vpop.xlane.xlu1 %418  ;;  %v416_v59 = vpop.xlane.xlu0 %415 }
  0xb8   : > { %v1011_v55 = vpop.eup %1010  ;;  %1022 = vrcp.f32 %v707_v50  ;;  %588 = vst.msk [vmem:[%s1308_s10 + $0x48] sm:$0xff] %vm578_vm1, %v555_v51  ;;  %v973_v56 = vmul.f32 -1.442695, %v555_v51  ;;  %v493_v57 = vmul.f32 %v1299_v0, %v419_v54  ;;  %587 = vst.msk [vmem:[%s1308_s10 + $0x40] sm:$0xff] %vm578_vm1, %v554_v52  ;;  %v972_v62 = vmul.f32 -1.442695, %v554_v52 }
  0xb9   : > { %v1013_v60 = vpop.eup %1012  ;;  %v710_v61 = vadd.f32 1.0, %v1011_v55  ;;  %1024 = vpow2.f32 %v970_v48  ;;  %v492_v63 = vmul.f32 %v1299_v0, %v416_v59  ;;  %v532_v55 = vld [vmem:[%s1297_s7 + $0x90] sm:$0xff] }
  0xba   : > { %v708_v1 = vadd.f32 1.0, %v1013_v60  ;;  %1026 = vpow2.f32 %v973_v56  ;;  %v557_v2 = vadd.f32 %v525_v53, %v493_v57 }
  0xbb   : > { %1028 = vrcp.f32 %v710_v61  ;;  %v556_v3 = vadd.f32 %v524_v58, %v492_v63  ;;  %v425_v5 = vpop.xlane.xlu1 %424  ;;  %v422_v10 = vpop.xlane.xlu0 %421 }
  0xbc   : > { %v1015_v6 = vpop.eup %1014  ;;  %1030 = vrcp.f32 %v708_v1  ;;  %590 = vst.msk [vmem:[%s1308_s10 + $0x58] sm:$0xff] %vm578_vm1, %v557_v2  ;;  %v975_v7 = vmul.f32 -1.442695, %v557_v2  ;;  %v495_v8 = vmul.f32 %v1299_v0, %v425_v5  ;;  %v494_v14 = vmul.f32 %v1299_v0, %v422_v10  ;;  %v535_v2 = vld [vmem:[%s1297_s7 + $0xa8] sm:$0xff] }
  0xbd   : > { %v1017_v11 = vpop.eup %1016  ;;  %v712_v12 = vadd.f32 1.0, %v1015_v6  ;;  %1032 = vpow2.f32 %v972_v62  ;;  %589 = vst.msk [vmem:[%s1308_s10 + $0x50] sm:$0xff] %vm578_vm1, %v556_v3  ;;  %v974_v13 = vmul.f32 -1.442695, %v556_v3 }
  0xbe   : > { %v711_v15 = vadd.f32 1.0, %v1017_v11  ;;  %1034 = vpow2.f32 %v975_v7  ;;  %v559_v16 = vadd.f32 %v527_v4, %v495_v8  ;;  %v558_v17 = vadd.f32 %v526_v9, %v494_v14  ;;  %v534_v8 = vld [vmem:[%s1297_s7 + $0xa0] sm:$0xff] }
  0xbf   : > { %1036 = vrcp.f32 %v712_v12  ;;  %v431_v19 = vpop.xlane.xlu1 %430  ;;  %v428_v24 = vpop.xlane.xlu0 %427 }
  0xc0   : > { %v1019_v20 = vpop.eup %1018  ;;  %1038 = vrcp.f32 %v711_v15  ;;  %592 = vst.msk [vmem:[%s1308_s10 + $0x68] sm:$0xff] %vm578_vm1, %v559_v16  ;;  %v977_v21 = vmul.f32 -1.442695, %v559_v16  ;;  %v497_v22 = vmul.f32 %v1299_v0, %v431_v19  ;;  %591 = vst.msk [vmem:[%s1308_s10 + $0x60] sm:$0xff] %vm578_vm1, %v558_v17  ;;  %v976_v27 = vmul.f32 -1.442695, %v558_v17 }
  0xc1   : > { %v1021_v25 = vpop.eup %1020  ;;  %v714_v26 = vadd.f32 1.0, %v1019_v20  ;;  %1040 = vpow2.f32 %v974_v13  ;;  %v496_v28 = vmul.f32 %v1299_v0, %v428_v24 }
  0xc2   : > { %v1023_v29 = vpop.eup %1022  ;;  %805 = vst.msk [vmem:[%s1363_s13 + $0x10] sm:$0xff] %vm578_vm1, %v1021_v25  ;;  %1042 = vpow2.f32 %v977_v21  ;;  %v561_v30 = vadd.f32 %v529_v18, %v497_v22  ;;  %v537_v18 = vld [vmem:[%s1297_s7 + $0xb8] sm:$0xff] }
  0xc3   : > { %v1025_v31 = vpop.eup %1024  ;;  %803 = vst.msk [vmem:[%s1363_s13] sm:$0xff] %vm578_vm1, %v1023_v29  ;;  %1044 = vrcp.f32 %v714_v26  ;;  %v560_v32 = vadd.f32 %v528_v23, %v496_v28  ;;  %v437_v34 = vpop.xlane.xlu1 %436  ;;  %v536_v23 = vld [vmem:[%s1297_s7 + $0xb0] sm:$0xff] }
  0xc4   : > { %v1027_v35 = vpop.eup %1026  ;;  %v713_v36 = vadd.f32 1.0, %v1025_v31  ;;  %1046 = vpow2.f32 %v976_v27  ;;  %594 = vst.msk [vmem:[%s1308_s10 + $0x78] sm:$0xff] %vm578_vm1, %v561_v30  ;;  %v979_v37 = vmul.f32 -1.442695, %v561_v30  ;;  %v499_v38 = vmul.f32 %v1299_v0, %v437_v34  ;;  %v434_v40 = vpop.xlane.xlu0 %433 }
  0xc5   : > { %v1029_v41 = vpop.eup %1028  ;;  %v716_v42 = vadd.f32 1.0, %v1027_v35  ;;  %593 = vst.msk [vmem:[%s1308_s10 + $0x70] sm:$0xff] %vm578_vm1, %v560_v32  ;;  %v978_v43 = vmul.f32 -1.442695, %v560_v32  ;;  %v498_v44 = vmul.f32 %v1299_v0, %v434_v40 }
  0xc6   : > { %v1031_v45 = vpop.eup %1030  ;;  %806 = vst.msk [vmem:[%s1363_s13 + $0x18] sm:$0xff] %vm578_vm1, %v1029_v41  ;;  %1048 = vrcp.f32 %v713_v36  ;;  %v563_v46 = vadd.f32 %v531_v33, %v499_v38  ;;  %v539_v33 = vld [vmem:[%s1297_s7 + $0xc8] sm:$0xff] }
  0xc7   : > { %v1033_v47 = vpop.eup %1032  ;;  %804 = vst.msk [vmem:[%s1363_s13 + $0x8] sm:$0xff] %vm578_vm1, %v1031_v45  ;;  %1050 = vrcp.f32 %v716_v42  ;;  %v562_v48 = vadd.f32 %v530_v39, %v498_v44  ;;  %v443_v50 = vpop.xlane.xlu1 %442  ;;  %v538_v39 = vld [vmem:[%s1297_s7 + $0xc0] sm:$0xff] }
  0xc8   : > { %v1035_v51 = vpop.eup %1034  ;;  %v715_v52 = vadd.f32 1.0, %v1033_v47  ;;  %1052 = vpow2.f32 %v979_v37  ;;  %596 = vst.msk [vmem:[%s1308_s10 + $0x88] sm:$0xff] %vm578_vm1, %v563_v46  ;;  %v981_v53 = vmul.f32 -1.442695, %v563_v46  ;;  %v501_v54 = vmul.f32 %v1299_v0, %v443_v50  ;;  %v440_v56 = vpop.xlane.xlu0 %439 }
  0xc9   : > { %v1037_v57 = vpop.eup %1036  ;;  %v718_v58 = vadd.f32 1.0, %v1035_v51  ;;  %1054 = vpow2.f32 %v978_v43  ;;  %595 = vst.msk [vmem:[%s1308_s10 + $0x80] sm:$0xff] %vm578_vm1, %v562_v48  ;;  %v980_v59 = vmul.f32 -1.442695, %v562_v48  ;;  %v500_v60 = vmul.f32 %v1299_v0, %v440_v56 }
  0xca   : > { %v1039_v61 = vpop.eup %1038  ;;  %808 = vst.msk [vmem:[%s1363_s13 + $0x28] sm:$0xff] %vm578_vm1, %v1037_v57  ;;  %1056 = vrcp.f32 %v715_v52  ;;  %v565_v62 = vadd.f32 %v533_v49, %v501_v54  ;;  %v541_v49 = vld [vmem:[%s1297_s7 + $0xd8] sm:$0xff] }
  0xcb   : > { %v1041_v63 = vpop.eup %1040  ;;  %807 = vst.msk [vmem:[%s1363_s13 + $0x20] sm:$0xff] %vm578_vm1, %v1039_v61  ;;  %1058 = vrcp.f32 %v718_v58  ;;  %v564_v1 = vadd.f32 %v532_v55, %v500_v60  ;;  %v449_v3 = vpop.xlane.xlu1 %448  ;;  %v540_v55 = vld [vmem:[%s1297_s7 + $0xd0] sm:$0xff] }
  0xcc   : > { %v1043_v4 = vpop.eup %1042  ;;  %v717_v5 = vadd.f32 1.0, %v1041_v63  ;;  %1060 = vpow2.f32 %v981_v53  ;;  %598 = vst.msk [vmem:[%s1308_s10 + $0x98] sm:$0xff] %vm578_vm1, %v565_v62  ;;  %v983_v6 = vmul.f32 -1.442695, %v565_v62  ;;  %v503_v7 = vmul.f32 %v1299_v0, %v449_v3  ;;  %v446_v9 = vpop.xlane.xlu0 %445 }
  0xcd   : > { %v1045_v10 = vpop.eup %1044  ;;  %v720_v11 = vadd.f32 1.0, %v1043_v4  ;;  %1062 = vpow2.f32 %v980_v59  ;;  %597 = vst.msk [vmem:[%s1308_s10 + $0x90] sm:$0xff] %vm578_vm1, %v564_v1  ;;  %v502_v12 = vmul.f32 %v1299_v0, %v446_v9  ;;  %v982_v14 = vmul.f32 -1.442695, %v564_v1 }
  0xce   : > { %v1047_v13 = vpop.eup %1046  ;;  %810 = vst.msk [vmem:[%s1363_s13 + $0x38] sm:$0xff] %vm578_vm1, %v1045_v10  ;;  %1064 = vrcp.f32 %v717_v5  ;;  %v567_v15 = vadd.f32 %v535_v2, %v503_v7  ;;  %v543_v2 = vld [vmem:[%s1297_s7 + $0xe8] sm:$0xff]  ;;  %v542_v7 = vld [vmem:[%s1297_s7 + $0xe0] sm:$0xff] }
  0xcf   : > { %1066 = vrcp.f32 %v720_v11  ;;  %v719_v16 = vadd.f32 1.0, %v1047_v13  ;;  %v566_v17 = vadd.f32 %v534_v8, %v502_v12  ;;  %v455_v19 = vpop.xlane.xlu1 %454 }
  0xd0   : > { %v1049_v20 = vpop.eup %1048  ;;  %1068 = vpow2.f32 %v983_v6  ;;  %600 = vst.msk [vmem:[%s1308_s10 + $0xa8] sm:$0xff] %vm578_vm1, %v567_v15  ;;  %v985_v21 = vmul.f32 -1.442695, %v567_v15  ;;  %v505_v22 = vmul.f32 %v1299_v0, %v455_v19  ;;  %v452_v24 = vpop.xlane.xlu0 %451  ;;  %v545_v19 = vld [vmem:[%s1297_s7 + $0xf8] sm:$0xff] }
  0xd1   : > { %v1051_v25 = vpop.eup %1050  ;;  %809 = vst.msk [vmem:[%s1363_s13 + $0x30] sm:$0xff] %vm578_vm1, %v1049_v20  ;;  %1070 = vrcp.f32 %v719_v16  ;;  %599 = vst.msk [vmem:[%s1308_s10 + $0xa0] sm:$0xff] %vm578_vm1, %v566_v17  ;;  %v984_v26 = vmul.f32 -1.442695, %v566_v17  ;;  %v504_v27 = vmul.f32 %v1299_v0, %v452_v24  ;;  %v544_v24 = vld [vmem:[%s1297_s7 + $0xf0] sm:$0xff] }
  0xd2   : > { %v1053_v28 = vpop.eup %1052  ;;  %812 = vst.msk [vmem:[%s1363_s13 + $0x48] sm:$0xff] %vm578_vm1, %v1051_v25  ;;  %1072 = vpow2.f32 %v982_v14  ;;  %v569_v29 = vadd.f32 %v537_v18, %v505_v22 }
  0xd3   : > { %v1055_v30 = vpop.eup %1054  ;;  %v722_v31 = vadd.f32 1.0, %v1053_v28  ;;  %1074 = vpow2.f32 %v985_v21  ;;  %v568_v32 = vadd.f32 %v536_v23, %v504_v27  ;;  %v461_v34 = vpop.xlane.xlu1 %460 }
  0xd4   : > { %v1057_v35 = vpop.eup %1056  ;;  %v721_v36 = vadd.f32 1.0, %v1055_v30  ;;  %1076 = vpow2.f32 %v984_v26  ;;  %602 = vst.msk [vmem:[%s1308_s10 + $0xb8] sm:$0xff] %vm578_vm1, %v569_v29  ;;  %v987_v37 = vmul.f32 -1.442695, %v569_v29  ;;  %v507_v38 = vmul.f32 %v1299_v0, %v461_v34  ;;  %v458_v40 = vpop.xlane.xlu0 %457 }
  0xd5   : > { %v1059_v41 = vpop.eup %1058  ;;  %811 = vst.msk [vmem:[%s1363_s13 + $0x40] sm:$0xff] %vm578_vm1, %v1057_v35  ;;  %1078 = vrcp.f32 %v722_v31  ;;  %601 = vst.msk [vmem:[%s1308_s10 + $0xb0] sm:$0xff] %vm578_vm1, %v568_v32  ;;  %v986_v42 = vmul.f32 -1.442695, %v568_v32  ;;  %v506_v43 = vmul.f32 %v1299_v0, %v458_v40 }
  0xd6   : > { %v1061_v44 = vpop.eup %1060  ;;  %814 = vst.msk [vmem:[%s1363_s13 + $0x58] sm:$0xff] %vm578_vm1, %v1059_v41  ;;  %1080 = vrcp.f32 %v721_v36  ;;  %v571_v45 = vadd.f32 %v539_v33, %v507_v38 }
  0xd7   : > { %v1063_v46 = vpop.eup %1062  ;;  %v724_v47 = vadd.f32 1.0, %v1061_v44  ;;  %1082 = vpow2.f32 %v987_v37  ;;  %v570_v48 = vadd.f32 %v538_v39, %v506_v43  ;;  %v467_v50 = vpop.xlane.xlu1 %466 }
  0xd8   : > { %v1065_v51 = vpop.eup %1064  ;;  %v723_v52 = vadd.f32 1.0, %v1063_v46  ;;  %1084 = vpow2.f32 %v986_v42  ;;  %604 = vst.msk [vmem:[%s1308_s10 + $0xc8] sm:$0xff] %vm578_vm1, %v571_v45  ;;  %v989_v53 = vmul.f32 -1.442695, %v571_v45  ;;  %v509_v54 = vmul.f32 %v1299_v0, %v467_v50  ;;  %v464_v56 = vpop.xlane.xlu0 %463 }
  0xd9   : > { %v1067_v57 = vpop.eup %1066  ;;  %813 = vst.msk [vmem:[%s1363_s13 + $0x50] sm:$0xff] %vm578_vm1, %v1065_v51  ;;  %1086 = vrcp.f32 %v724_v47  ;;  %603 = vst.msk [vmem:[%s1308_s10 + $0xc0] sm:$0xff] %vm578_vm1, %v570_v48  ;;  %v988_v58 = vmul.f32 -1.442695, %v570_v48  ;;  %v508_v59 = vmul.f32 %v1299_v0, %v464_v56 }
  0xda   : > { %v1069_v60 = vpop.eup %1068  ;;  %816 = vst.msk [vmem:[%s1363_s13 + $0x68] sm:$0xff] %vm578_vm1, %v1067_v57  ;;  %1088 = vrcp.f32 %v723_v52  ;;  %v573_v61 = vadd.f32 %v541_v49, %v509_v54 }
  0xdb   : > { %v1071_v62 = vpop.eup %1070  ;;  %v726_v63 = vadd.f32 1.0, %v1069_v60  ;;  %1090 = vpow2.f32 %v989_v53  ;;  %v572_v1 = vadd.f32 %v540_v55, %v508_v59  ;;  %v473_v3 = vpop.xlane.xlu1 %472 }
  0xdc   : > { %v1073_v4 = vpop.eup %1072  ;;  %815 = vst.msk [vmem:[%s1363_s13 + $0x60] sm:$0xff] %vm578_vm1, %v1071_v62  ;;  %1092 = vpow2.f32 %v988_v58  ;;  %606 = vst.msk [vmem:[%s1308_s10 + $0xd8] sm:$0xff] %vm578_vm1, %v573_v61  ;;  %v991_v5 = vmul.f32 -1.442695, %v573_v61  ;;  %v511_v6 = vmul.f32 %v1299_v0, %v473_v3  ;;  %v470_v8 = vpop.xlane.xlu0 %469 }
  0xdd   : > { %v1075_v9 = vpop.eup %1074  ;;  %1094 = vrcp.f32 %v726_v63  ;;  %v725_v10 = vadd.f32 1.0, %v1073_v4  ;;  %605 = vst.msk [vmem:[%s1308_s10 + $0xd0] sm:$0xff] %vm578_vm1, %v572_v1  ;;  %v510_v11 = vmul.f32 %v1299_v0, %v470_v8  ;;  %v990_v14 = vmul.f32 -1.442695, %v572_v1 }
  0xde   : > { %v1077_v12 = vpop.eup %1076  ;;  %v728_v13 = vadd.f32 1.0, %v1075_v9  ;;  %1096 = vpow2.f32 %v991_v5  ;;  %v575_v15 = vadd.f32 %v543_v2, %v511_v6 }
  0xdf   : > { %v1079_v16 = vpop.eup %1078  ;;  %1098 = vrcp.f32 %v725_v10  ;;  %v727_v17 = vadd.f32 1.0, %v1077_v12  ;;  %v574_v18 = vadd.f32 %v542_v7, %v510_v11  ;;  %v479_v20 = vpop.xlane.xlu1 %478 }
  0xe0   : > { %v1081_v21 = vpop.eup %1080  ;;  %818 = vst.msk [vmem:[%s1363_s13 + $0x78] sm:$0xff] %vm578_vm1, %v1079_v16  ;;  %1100 = vrcp.f32 %v728_v13  ;;  %608 = vst.msk [vmem:[%s1308_s10 + $0xe8] sm:$0xff] %vm578_vm1, %v575_v15  ;;  %v993_v22 = vmul.f32 -1.442695, %v575_v15  ;;  %v513_v23 = vmul.f32 %v1299_v0, %v479_v20  ;;  %v476_v25 = vpop.xlane.xlu0 %475 }
  0xe1   : > { %v1083_v26 = vpop.eup %1082  ;;  %817 = vst.msk [vmem:[%s1363_s13 + $0x70] sm:$0xff] %vm578_vm1, %v1081_v21  ;;  %1102 = vrcp.f32 %v727_v17  ;;  %607 = vst.msk [vmem:[%s1308_s10 + $0xe0] sm:$0xff] %vm578_vm1, %v574_v18  ;;  %v512_v27 = vmul.f32 %v1299_v0, %v476_v25  ;;  %v992_v30 = vmul.f32 -1.442695, %v574_v18 }
  0xe2   : > { %v1085_v28 = vpop.eup %1084  ;;  %v730_v29 = vadd.f32 1.0, %v1083_v26  ;;  %1104 = vpow2.f32 %v990_v14  ;;  %v577_v31 = vadd.f32 %v545_v19, %v513_v23 }
  0xe3   : > { %v1087_v32 = vpop.eup %1086  ;;  %v729_v33 = vadd.f32 1.0, %v1085_v28  ;;  %1106 = vpow2.f32 %v993_v22  ;;  %v576_v34 = vadd.f32 %v544_v24, %v512_v27 }
  0xe4   : > { %v1089_v35 = vpop.eup %1088  ;;  %820 = vst.msk [vmem:[%s1363_s13 + $0x88] sm:$0xff] %vm578_vm1, %v1087_v32  ;;  %1108 = vrcp.f32 %v730_v29  ;;  %610 = vst.msk [vmem:[%s1308_s10 + $0xf8] sm:$0xff] %vm578_vm1, %v577_v31  ;;  %v995_v36 = vmul.f32 -1.442695, %v577_v31 }
  0xe5   : > { %v1091_v0 = vpop.eup %1090  ;;  %819 = vst.msk [vmem:[%s1363_s13 + $0x80] sm:$0xff] %vm578_vm1, %v1089_v35  ;;  %1110 = vrcp.f32 %v729_v33  ;;  %609 = vst.msk [vmem:[%s1308_s10 + $0xf0] sm:$0xff] %vm578_vm1, %v576_v34  ;;  %v994_v39 = vmul.f32 -1.442695, %v576_v34 }
  0xe6   : > { %v1093_v37 = vpop.eup %1092  ;;  %v732_v38 = vadd.f32 1.0, %v1091_v0  ;;  %1112 = vpow2.f32 %v992_v30 }
  0xe7   : > { %v1095_v40 = vpop.eup %1094  ;;  %v731_v41 = vadd.f32 1.0, %v1093_v37  ;;  %1114 = vpow2.f32 %v995_v36 }
  0xe8   : > { %v1097_v42 = vpop.eup %1096  ;;  %822 = vst.msk [vmem:[%s1363_s13 + $0x98] sm:$0xff] %vm578_vm1, %v1095_v40  ;;  %1116 = vrcp.f32 %v732_v38 }
  0xe9   : > { %v1099_v43 = vpop.eup %1098  ;;  %1118 = vrcp.f32 %v731_v41  ;;  %v734_v44 = vadd.f32 1.0, %v1097_v42 }
  0xea   : > { %v1101_v45 = vpop.eup %1100  ;;  %821 = vst.msk [vmem:[%s1363_s13 + $0x90] sm:$0xff] %vm578_vm1, %v1099_v43  ;;  %1120 = vpow2.f32 %v994_v39 }
  0xeb   : > { %v1103_v46 = vpop.eup %1102  ;;  %824 = vst.msk [vmem:[%s1363_s13 + $0xa8] sm:$0xff] %vm578_vm1, %v1101_v45  ;;  %1122 = vrcp.f32 %v734_v44 }
  0xec   : > { %v1105_v47 = vpop.eup %1104  ;;  %823 = vst.msk [vmem:[%s1363_s13 + $0xa0] sm:$0xff] %vm578_vm1, %v1103_v46 }
  0xed   : > { %v1107_v48 = vpop.eup %1106  ;;  %v733_v49 = vadd.f32 1.0, %v1105_v47 }
  0xee   : > { %v1109_v50 = vpop.eup %1108  ;;  %v736_v51 = vadd.f32 1.0, %v1107_v48 }
  0xef   : > { %v1111_v52 = vpop.eup %1110  ;;  %826 = vst.msk [vmem:[%s1363_s13 + $0xb8] sm:$0xff] %vm578_vm1, %v1109_v50  ;;  %1124 = vrcp.f32 %v733_v49 }
  0xf0   : > { %v1113_v53 = vpop.eup %1112  ;;  %825 = vst.msk [vmem:[%s1363_s13 + $0xb0] sm:$0xff] %vm578_vm1, %v1111_v52  ;;  %1126 = vrcp.f32 %v736_v51 }
  0xf1   : > { %v1115_v54 = vpop.eup %1114  ;;  %v735_v55 = vadd.f32 1.0, %v1113_v53 }
  0xf2   : > { %v1117_v56 = vpop.eup %1116  ;;  %v738_v57 = vadd.f32 1.0, %v1115_v54 }
  0xf3   : > { %v1119_v58 = vpop.eup %1118  ;;  %828 = vst.msk [vmem:[%s1363_s13 + $0xc8] sm:$0xff] %vm578_vm1, %v1117_v56  ;;  %1128 = vrcp.f32 %v735_v55 }
  0xf4   : > { %v1121_v59 = vpop.eup %1120  ;;  %827 = vst.msk [vmem:[%s1363_s13 + $0xc0] sm:$0xff] %vm578_vm1, %v1119_v58  ;;  %1130 = vrcp.f32 %v738_v57 }
  0xf5   : > { %v1123_v60 = vpop.eup %1122  ;;  %v737_v61 = vadd.f32 1.0, %v1121_v59 }
  0xf6   : > { %830 = vst.msk [vmem:[%s1363_s13 + $0xd8] sm:$0xff] %vm578_vm1, %v1123_v60 }
  0xf7   : > { %1132 = vrcp.f32 %v737_v61 }
  0xf9   : > { %v1125_v62 = vpop.eup %1124 }
  0xfa   : > { %v1127_v63 = vpop.eup %1126  ;;  %829 = vst.msk [vmem:[%s1363_s13 + $0xd0] sm:$0xff] %vm578_vm1, %v1125_v62 }
  0xfb   : > { %832 = vst.msk [vmem:[%s1363_s13 + $0xe8] sm:$0xff] %vm578_vm1, %v1127_v63 }
  0xfd   : > { %v1129_v1 = vpop.eup %1128 }
  0xfe   : > { %v1131_v2 = vpop.eup %1130  ;;  %831 = vst.msk [vmem:[%s1363_s13 + $0xe0] sm:$0xff] %vm578_vm1, %v1129_v1 }
  0xff   : > { %834 = vst.msk [vmem:[%s1363_s13 + $0xf8] sm:$0xff] %vm578_vm1, %v1131_v2 }
 0x101   : > { %v1133_v3 = vpop.eup %1132 }
 0x102   : > { %833 = vst.msk [vmem:[%s1363_s13 + $0xf0] sm:$0xff] %vm578_vm1, %v1133_v3 }
 0x103 PF: > { %s17_s20 = sadd.s32 1, %s1140_s20  }
 0x104   : > { %p14_p4 = scmp.ge.s32.totalorder %s17_s20, 4  }
 0x106   :  { %16 = sbr.rel (!%p14_p4) target bundleno = 2 (0x2), region = 84 }

</bundles_post_ra>
